<compile_context>
chip_gen: v7x
topology: tpu7x:2x2x1
jax: 0.10.0
libtpu: 0.0.40
codegen_flags: <defaults>
</compile_context>

<pallas_src>
import functools

import jax
import jax.numpy as jnp
from jax.experimental import pallas as pl
from jax.experimental.pallas import tpu as pltpu


def _upsample_kernel(m_ref, x_ref, o_ref):
    # m_ref: (H*W, Hs*Ws)  0/1 replication matrix (grid-invariant, fetched once)
    # x_ref: (TC, H*W)     flattened input planes
    # o_ref: (TC, Hs*Ws)   flattened upsampled planes (lane-dense last dim)
    o_ref[...] = jnp.dot(
        x_ref[...], m_ref[...], preferred_element_type=jnp.float32
    ).astype(o_ref.dtype)


def _plane_batch(nc, hw, hsws, itemsize):
    """Choose how many (N*C) planes to process per grid step."""
    align = max(8, 32 // itemsize)            # sublane tile: 8 (f32) / 16 (bf16)
    per_plane = 2 * (hw + hsws) * itemsize    # double-buffered input + output blocks
    budget = 8 * 1024 * 1024                  # headroom under v7x's 32 MiB scoped VMEM
    tc = max(1, budget // per_plane)
    if nc >= 4 * align:
        tc = min(tc, nc // 2)                 # keep >=2 grid steps (v7x has 2 TCs)
    if tc >= nc:
        return nc
    return max(align, (tc // align) * align)


# Kronecker matrix kept modest so it (double-buffered) fits comfortably in VMEM.
_MAX_KRON_BYTES = 8 * 1024 * 1024


@functools.partial(jax.jit, static_argnames="scale_factor")
def upsample_nearest(x, scale_factor=2):
    """Nearest-neighbor upsample of an NCHW tensor by an integer factor."""
    s = int(scale_factor)
    assert s == scale_factor and s >= 1, "only integer scale_factor supported"
    N, C, H, W = x.shape
    if s == 1:
        return x

    hw = H * W
    hs, ws = H * s, W * s
    hsws = hs * ws
    itemsize = jnp.dtype(x.dtype).itemsize

    if (not jnp.issubdtype(x.dtype, jnp.floating)
            or hw * hsws * itemsize > _MAX_KRON_BYTES):
        # TODO(synk): non-float dtypes (no int MXU path on v7x) and very large
        # spatial planes fall back to plain-JAX nearest-neighbor.
        return jnp.repeat(jnp.repeat(x, s, axis=2), s, axis=3)

    # 0/1 replication matrix: M[h*W + w, (h*s + a)*Ws + w*s + b] = 1.
    p = jnp.arange(hw)
    q = jnp.arange(hsws)
    ph, pw = p // W, p % W
    qh, qw = (q // ws) // s, (q % ws) // s
    M = ((ph[:, None] == qh[None, :]) &
         (pw[:, None] == qw[None, :])).astype(x.dtype)

    nc = N * C
    tc = _plane_batch(nc, hw, hsws, itemsize)
    grid = (pl.cdiv(nc, tc),)

    x2d = x.reshape(nc, hw)   # contiguous reshape: free

    out = pl.pallas_call(
        _upsample_kernel,
        out_shape=jax.ShapeDtypeStruct((nc, hsws), x.dtype),
        grid_spec=pltpu.PrefetchScalarGridSpec(
            num_scalar_prefetch=0,
            grid=grid,
            in_specs=[
                pl.BlockSpec((hw, hsws), lambda i: (0, 0)),   # M: fetched once
                pl.BlockSpec((tc, hw), lambda i: (i, 0)),     # TC input planes
            ],
            out_specs=pl.BlockSpec((tc, hsws), lambda i: (i, 0)),
        ),
        compiler_params=pltpu.CompilerParams(
            dimension_semantics=("parallel",)),
    )(M, x2d)

    return out.reshape(N, C, hs, ws)


if __name__ == "__main__":
    key = jax.random.PRNGKey(0)
    N, C, H, W = 2, 4, 16, 16
    scale = 2  # YOLOv3 uses Upsample(scale_factor=2, mode='nearest')

    x = jax.random.normal(key, (N, C, H, W), dtype=jnp.float32)

    y = jax.block_until_ready(upsample_nearest(x, scale_factor=scale))

    # Reference: exact nearest-neighbor semantics of F.interpolate(mode='nearest').
    ref = jnp.repeat(jnp.repeat(x, scale, axis=2), scale, axis=3)

    assert y.shape == (N, C, H * scale, W * scale), y.shape
    assert y.dtype == x.dtype, y.dtype
    assert bool(jnp.all(y == ref)), "mismatch vs nearest-neighbor reference"

    print("KERNEL_OK")
</pallas_src>

<mosaic_0001>
module attributes {stable_mosaic.version = 11 : i64} {
  func.func @_upsample_kernel(%arg0: i32, %arg1: memref<256x1024xf32, #tpu.memory_space<vmem>>, %arg2: memref<8x256xf32, #tpu.memory_space<vmem>>, %arg3: memref<8x1024xf32, #tpu.memory_space<vmem>>) attributes {dimension_semantics = [#tpu.dimension_semantics<parallel>], iteration_bounds = array<i64: 1>, scalar_prefetch = 0 : i64, scratch_operands = 0 : i64, tpu.core_type = #tpu.core_type<tc>, window_params = [{pipeline_mode = #tpu.pipeline_mode<synchronous>, transform_indices = @transform_0, window_bounds = array<i64: 256, 1024>}, {transform_indices = @transform_1, window_bounds = array<i64: 8, 256>}, {transform_indices = @transform_2, window_bounds = array<i64: 8, 1024>}]} {
    %c0 = arith.constant 0 : index
    %c0_0 = arith.constant 0 : index
    %0 = vector.load %arg2[%c0, %c0_0] : memref<8x256xf32, #tpu.memory_space<vmem>>, vector<8x256xf32>
    %c0_1 = arith.constant 0 : index
    %c0_2 = arith.constant 0 : index
    %1 = vector.load %arg1[%c0_1, %c0_2] : memref<256x1024xf32, #tpu.memory_space<vmem>>, vector<256x1024xf32>
    %cst = arith.constant dense<0.000000e+00> : vector<8x1024xf32>
    %2 = tpu.matmul %0, %1, %cst {dimension_numbers = #tpu.dot_dimension_numbers<[1], [0], [0], [1], [0, 0, 1, 1], [], []>} : vector<8x256xf32>, vector<256x1024xf32>, vector<8x1024xf32> -> vector<8x1024xf32>
    %c0_3 = arith.constant 0 : index
    %c0_4 = arith.constant 0 : index
    %3 = vector.load %arg3[%c0_3, %c0_4] : memref<8x1024xf32, #tpu.memory_space<vmem>>, vector<8x1024xf32>
    tpu.vector_store %arg3[%c0_3, %c0_4], %2 {strides = array<i32>} : memref<8x1024xf32, #tpu.memory_space<vmem>>, vector<8x1024xf32>,
    return
  }
  func.func @transform_0(%arg0: i32) -> (i32, i32) {
    %c0_i32 = arith.constant 0 : i32
    %c0_i32_0 = arith.constant 0 : i32
    %c0_i32_1 = arith.constant 0 : i32
    return %c0_i32, %c0_i32_0 : i32, i32
  }
  func.func @transform_1(%arg0: i32) -> (i32, i32) {
    %c0_i32 = arith.constant 0 : i32
    %c0_i32_0 = arith.constant 0 : i32
    return %arg0, %c0_i32 : i32, i32
  }
  func.func @transform_2(%arg0: i32) -> (i32, i32) {
    %c0_i32 = arith.constant 0 : i32
    %c0_i32_0 = arith.constant 0 : i32
    return %arg0, %c0_i32 : i32, i32
  }
}

</mosaic_0001>

<bundles_post_ra>
// kernel: upsample_nearest.1
= control target key start
LH: loop header
LB: loop body
LE: loop exit
PB: predicated region body
PF: predicated region fallthrough
CT: control target
= control target key end

     0   :  { %s1646_s0 = inlined_call_operand.vmem [shape: f32[256,1024], index: 0, kind: input, shape index: {}]   ;;  %s1647_s1 = inlined_call_operand.vmem [shape: f32[8,256], index: 1, kind: input, shape index: {}]   ;;  %s1648_s2 = inlined_call_operand.vmem [shape: f32[8,1024], index: 2, kind: output, shape index: {}]  }
   0x1   :  { %v14_v0 = vld [vmem:[%s1646_s0 + $0x8] sm:$0xff]  ;;  %v16_v2 = vld [vmem:[%s1646_s0 + $0x18] sm:$0xff]  ;;  %v13_v5 = vld [vmem:[%s1646_s0] sm:$0xff] }
   0x2   :  { %v22_v1 = vld [vmem:[%s1646_s0 + $0x48] sm:$0xff]  ;;  %v24_v4 = vld [vmem:[%s1646_s0 + $0x58] sm:$0xff]  ;;  %v21_v6 = vld [vmem:[%s1646_s0 + $0x40] sm:$0xff] }
   0x3   :  { %v565_v3 = vpack.c.bf16 %v22_v1, %v14_v0  ;;  %v629_v7 = vpack.c.bf16 %v24_v4, %v16_v2  ;;  %v567_v8 = vpack.c.bf16 %v21_v6, %v13_v5  ;;  %v15_v9 = vld [vmem:[%s1646_s0 + $0x10] sm:$0xff]  ;;  %v30_v11 = vld [vmem:[%s1646_s0 + $0x88] sm:$0xff]  ;;  %v32_v14 = vld [vmem:[%s1646_s0 + $0x98] sm:$0xff] }
   0x4   :  { %v23_v10 = vld [vmem:[%s1646_s0 + $0x50] sm:$0xff]  ;;  %v38_v13 = vld [vmem:[%s1646_s0 + $0xc8] sm:$0xff]  ;;  %v40_v15 = vld [vmem:[%s1646_s0 + $0xd8] sm:$0xff] }
   0x5   :  { %566 = vmatprep.subr.bf16.mxu0 %v565_v3  ;;  %v631_v12 = vpack.c.bf16 %v23_v10, %v15_v9  ;;  %630 = vmatprep.subr.bf16.mxu1 %v629_v7  ;;  %v569_v16 = vpack.c.bf16 %v38_v13, %v30_v11  ;;  %v633_v17 = vpack.c.bf16 %v40_v15, %v32_v14  ;;  %v29_v18 = vld [vmem:[%s1646_s0 + $0x80] sm:$0xff]  ;;  %v31_v20 = vld [vmem:[%s1646_s0 + $0x90] sm:$0xff]  ;;  %v46_v23 = vld [vmem:[%s1646_s0 + $0x108] sm:$0xff] }
   0x6   :  { %568 = vmatpush1.bf16.msra.mxu0 %v567_v8  ;;  %v37_v19 = vld [vmem:[%s1646_s0 + $0xc0] sm:$0xff]  ;;  %v39_v22 = vld [vmem:[%s1646_s0 + $0xd0] sm:$0xff]  ;;  %v54_v24 = vld [vmem:[%s1646_s0 + $0x148] sm:$0xff] }
   0x7   :  { %632 = vmatpush1.bf16.msra.mxu1 %v631_v12  ;;  %v571_v21 = vpack.c.bf16 %v37_v19, %v29_v18  ;;  %570 = vmatprep.subr.bf16.mxu0 %v569_v16  ;;  %v635_v25 = vpack.c.bf16 %v39_v22, %v31_v20  ;;  %v573_v26 = vpack.c.bf16 %v54_v24, %v46_v23  ;;  %v48_v27 = vld [vmem:[%s1646_s0 + $0x118] sm:$0xff]  ;;  %v45_v29 = vld [vmem:[%s1646_s0 + $0x100] sm:$0xff]  ;;  %v47_v32 = vld [vmem:[%s1646_s0 + $0x110] sm:$0xff] }
   0x8   :  { %634 = vmatprep.subr.bf16.mxu1 %v633_v17  ;;  %v56_v28 = vld [vmem:[%s1646_s0 + $0x158] sm:$0xff]  ;;  %v53_v31 = vld [vmem:[%s1646_s0 + $0x140] sm:$0xff]  ;;  %v55_v33 = vld [vmem:[%s1646_s0 + $0x150] sm:$0xff] }
   0x9   :  { %v637_v30 = vpack.c.bf16 %v56_v28, %v48_v27  ;;  %v575_v34 = vpack.c.bf16 %v53_v31, %v45_v29  ;;  %v62_v35 = vld [vmem:[%s1646_s0 + $0x188] sm:$0xff]  ;;  %v64_v37 = vld [vmem:[%s1646_s0 + $0x198] sm:$0xff]  ;;  %v639_v38 = vpack.c.bf16 %v55_v33, %v47_v32  ;;  %v61_v41 = vld [vmem:[%s1646_s0 + $0x180] sm:$0xff] }
   0xa   :  { %572 = vmatpush1.bf16.msra.mxu0 %v571_v21  ;;  %v70_v36 = vld [vmem:[%s1646_s0 + $0x1c8] sm:$0xff]  ;;  %v72_v40 = vld [vmem:[%s1646_s0 + $0x1d8] sm:$0xff]  ;;  %v69_v42 = vld [vmem:[%s1646_s0 + $0x1c0] sm:$0xff] }
   0xb   :  { %636 = vmatpush1.bf16.msra.mxu1 %v635_v25  ;;  %574 = vmatprep.subr.bf16.mxu0 %v573_v26  ;;  %v577_v39 = vpack.c.bf16 %v70_v36, %v62_v35  ;;  %v641_v43 = vpack.c.bf16 %v72_v40, %v64_v37  ;;  %v63_v44 = vld [vmem:[%s1646_s0 + $0x190] sm:$0xff]  ;;  %v78_v46 = vld [vmem:[%s1646_s0 + $0x208] sm:$0xff]  ;;  %v80_v48 = vld [vmem:[%s1646_s0 + $0x218] sm:$0xff]  ;;  %v579_v50 = vpack.c.bf16 %v69_v42, %v61_v41 }
   0xc   :  { %638 = vmatprep.subr.bf16.mxu1 %v637_v30  ;;  %v71_v45 = vld [vmem:[%s1646_s0 + $0x1d0] sm:$0xff]  ;;  %v86_v47 = vld [vmem:[%s1646_s0 + $0x248] sm:$0xff]  ;;  %v88_v49 = vld [vmem:[%s1646_s0 + $0x258] sm:$0xff] }
   0xd   :  { %v643_v51 = vpack.c.bf16 %v71_v45, %v63_v44  ;;  %v581_v52 = vpack.c.bf16 %v86_v47, %v78_v46  ;;  %v77_v53 = vld [vmem:[%s1646_s0 + $0x200] sm:$0xff]  ;;  %v79_v55 = vld [vmem:[%s1646_s0 + $0x210] sm:$0xff]  ;;  %v645_v56 = vpack.c.bf16 %v88_v49, %v80_v48  ;;  %v94_v58 = vld [vmem:[%s1646_s0 + $0x288] sm:$0xff] }
   0xe   :  { %576 = vmatpush1.bf16.msra.mxu0 %v575_v34  ;;  %v85_v54 = vld [vmem:[%s1646_s0 + $0x240] sm:$0xff]  ;;  %v87_v57 = vld [vmem:[%s1646_s0 + $0x250] sm:$0xff]  ;;  %v102_v59 = vld [vmem:[%s1646_s0 + $0x2c8] sm:$0xff] }
   0xf   :  { %640 = vmatpush1.bf16.msra.mxu1 %v639_v38  ;;  %578 = vmatprep.subr.bf16.mxu0 %v577_v39  ;;  %v96_v60 = vld [vmem:[%s1646_s0 + $0x298] sm:$0xff]  ;;  %v583_v62 = vpack.c.bf16 %v85_v54, %v77_v53  ;;  %v647_v63 = vpack.c.bf16 %v87_v57, %v79_v55  ;;  %v585_v0 = vpack.c.bf16 %v102_v59, %v94_v58  ;;  %v93_v1 = vld [vmem:[%s1646_s0 + $0x280] sm:$0xff]  ;;  %v95_v3 = vld [vmem:[%s1646_s0 + $0x290] sm:$0xff] }
  0x10   :  { %642 = vmatprep.subr.bf16.mxu1 %v641_v43  ;;  %v104_v61 = vld [vmem:[%s1646_s0 + $0x2d8] sm:$0xff]  ;;  %v101_v2 = vld [vmem:[%s1646_s0 + $0x2c0] sm:$0xff]  ;;  %v103_v5 = vld [vmem:[%s1646_s0 + $0x2d0] sm:$0xff] }
  0x11   :  { %v649_v4 = vpack.c.bf16 %v104_v61, %v96_v60  ;;  %v110_v6 = vld [vmem:[%s1646_s0 + $0x308] sm:$0xff]  ;;  %v112_v8 = vld [vmem:[%s1646_s0 + $0x318] sm:$0xff]  ;;  %v587_v10 = vpack.c.bf16 %v101_v2, %v93_v1  ;;  %v651_v11 = vpack.c.bf16 %v103_v5, %v95_v3  ;;  %v109_v13 = vld [vmem:[%s1646_s0 + $0x300] sm:$0xff] }
  0x12   :  { %580 = vmatpush1.bf16.msra.mxu0 %v579_v50  ;;  %v118_v7 = vld [vmem:[%s1646_s0 + $0x348] sm:$0xff]  ;;  %v120_v9 = vld [vmem:[%s1646_s0 + $0x358] sm:$0xff]  ;;  %v117_v14 = vld [vmem:[%s1646_s0 + $0x340] sm:$0xff] }
  0x13   :  { %644 = vmatpush1.bf16.msra.mxu1 %v643_v51  ;;  %582 = vmatprep.subr.bf16.mxu0 %v581_v52  ;;  %v589_v12 = vpack.c.bf16 %v118_v7, %v110_v6  ;;  %v111_v15 = vld [vmem:[%s1646_s0 + $0x310] sm:$0xff]  ;;  %v653_v16 = vpack.c.bf16 %v120_v9, %v112_v8  ;;  %v126_v18 = vld [vmem:[%s1646_s0 + $0x388] sm:$0xff]  ;;  %v128_v20 = vld [vmem:[%s1646_s0 + $0x398] sm:$0xff]  ;;  %v591_v22 = vpack.c.bf16 %v117_v14, %v109_v13 }
  0x14   :  { %646 = vmatprep.subr.bf16.mxu1 %v645_v56  ;;  %v119_v17 = vld [vmem:[%s1646_s0 + $0x350] sm:$0xff]  ;;  %v134_v19 = vld [vmem:[%s1646_s0 + $0x3c8] sm:$0xff]  ;;  %v136_v21 = vld [vmem:[%s1646_s0 + $0x3d8] sm:$0xff] }
  0x15   :  { %v655_v23 = vpack.c.bf16 %v119_v17, %v111_v15  ;;  %v593_v24 = vpack.c.bf16 %v134_v19, %v126_v18  ;;  %v125_v25 = vld [vmem:[%s1646_s0 + $0x380] sm:$0xff]  ;;  %v127_v27 = vld [vmem:[%s1646_s0 + $0x390] sm:$0xff]  ;;  %v657_v28 = vpack.c.bf16 %v136_v21, %v128_v20  ;;  %v142_v30 = vld [vmem:[%s1646_s0 + $0x408] sm:$0xff] }
  0x16   :  { %584 = vmatpush1.bf16.msra.mxu0 %v583_v62  ;;  %v133_v26 = vld [vmem:[%s1646_s0 + $0x3c0] sm:$0xff]  ;;  %v135_v29 = vld [vmem:[%s1646_s0 + $0x3d0] sm:$0xff]  ;;  %v150_v31 = vld [vmem:[%s1646_s0 + $0x448] sm:$0xff] }
  0x17   :  { %648 = vmatpush1.bf16.msra.mxu1 %v647_v63  ;;  %586 = vmatprep.subr.bf16.mxu0 %v585_v0  ;;  %v144_v32 = vld [vmem:[%s1646_s0 + $0x418] sm:$0xff]  ;;  %v595_v34 = vpack.c.bf16 %v133_v26, %v125_v25  ;;  %v659_v35 = vpack.c.bf16 %v135_v29, %v127_v27  ;;  %v597_v36 = vpack.c.bf16 %v150_v31, %v142_v30  ;;  %v141_v37 = vld [vmem:[%s1646_s0 + $0x400] sm:$0xff]  ;;  %v143_v39 = vld [vmem:[%s1646_s0 + $0x410] sm:$0xff] }
  0x18   :  { %650 = vmatprep.subr.bf16.mxu1 %v649_v4  ;;  %v152_v33 = vld [vmem:[%s1646_s0 + $0x458] sm:$0xff]  ;;  %v149_v38 = vld [vmem:[%s1646_s0 + $0x440] sm:$0xff]  ;;  %v151_v41 = vld [vmem:[%s1646_s0 + $0x450] sm:$0xff] }
  0x19   :  { %v661_v40 = vpack.c.bf16 %v152_v33, %v144_v32  ;;  %v158_v42 = vld [vmem:[%s1646_s0 + $0x488] sm:$0xff]  ;;  %v160_v44 = vld [vmem:[%s1646_s0 + $0x498] sm:$0xff]  ;;  %v599_v46 = vpack.c.bf16 %v149_v38, %v141_v37  ;;  %v663_v47 = vpack.c.bf16 %v151_v41, %v143_v39  ;;  %v157_v49 = vld [vmem:[%s1646_s0 + $0x480] sm:$0xff] }
  0x1a   :  { %588 = vmatpush1.bf16.msra.mxu0 %v587_v10  ;;  %v166_v43 = vld [vmem:[%s1646_s0 + $0x4c8] sm:$0xff]  ;;  %v168_v45 = vld [vmem:[%s1646_s0 + $0x4d8] sm:$0xff]  ;;  %v165_v50 = vld [vmem:[%s1646_s0 + $0x4c0] sm:$0xff] }
  0x1b   :  { %652 = vmatpush1.bf16.msra.mxu1 %v651_v11  ;;  %590 = vmatprep.subr.bf16.mxu0 %v589_v12  ;;  %v601_v48 = vpack.c.bf16 %v166_v43, %v158_v42  ;;  %v159_v51 = vld [vmem:[%s1646_s0 + $0x490] sm:$0xff]  ;;  %v665_v52 = vpack.c.bf16 %v168_v45, %v160_v44  ;;  %v174_v54 = vld [vmem:[%s1646_s0 + $0x508] sm:$0xff]  ;;  %v176_v56 = vld [vmem:[%s1646_s0 + $0x518] sm:$0xff]  ;;  %v603_v58 = vpack.c.bf16 %v165_v50, %v157_v49 }
  0x1c   :  { %654 = vmatprep.subr.bf16.mxu1 %v653_v16  ;;  %v167_v53 = vld [vmem:[%s1646_s0 + $0x4d0] sm:$0xff]  ;;  %v182_v55 = vld [vmem:[%s1646_s0 + $0x548] sm:$0xff]  ;;  %v184_v57 = vld [vmem:[%s1646_s0 + $0x558] sm:$0xff] }
  0x1d   :  { %v667_v59 = vpack.c.bf16 %v167_v53, %v159_v51  ;;  %v605_v60 = vpack.c.bf16 %v182_v55, %v174_v54  ;;  %v173_v61 = vld [vmem:[%s1646_s0 + $0x500] sm:$0xff]  ;;  %v175_v63 = vld [vmem:[%s1646_s0 + $0x510] sm:$0xff]  ;;  %v669_v0 = vpack.c.bf16 %v184_v57, %v176_v56  ;;  %v190_v2 = vld [vmem:[%s1646_s0 + $0x588] sm:$0xff] }
  0x1e   :  { %592 = vmatpush1.bf16.msra.mxu0 %v591_v22  ;;  %v181_v62 = vld [vmem:[%s1646_s0 + $0x540] sm:$0xff]  ;;  %v183_v1 = vld [vmem:[%s1646_s0 + $0x550] sm:$0xff]  ;;  %v198_v3 = vld [vmem:[%s1646_s0 + $0x5c8] sm:$0xff] }
  0x1f   :  { %656 = vmatpush1.bf16.msra.mxu1 %v655_v23  ;;  %594 = vmatprep.subr.bf16.mxu0 %v593_v24  ;;  %v192_v4 = vld [vmem:[%s1646_s0 + $0x598] sm:$0xff]  ;;  %v607_v6 = vpack.c.bf16 %v181_v62, %v173_v61  ;;  %v189_v7 = vld [vmem:[%s1646_s0 + $0x580] sm:$0xff]  ;;  %v671_v8 = vpack.c.bf16 %v183_v1, %v175_v63  ;;  %v609_v9 = vpack.c.bf16 %v198_v3, %v190_v2  ;;  %v191_v11 = vld [vmem:[%s1646_s0 + $0x590] sm:$0xff] }
  0x20   :  { %658 = vmatprep.subr.bf16.mxu1 %v657_v28  ;;  %v200_v5 = vld [vmem:[%s1646_s0 + $0x5d8] sm:$0xff]  ;;  %v197_v10 = vld [vmem:[%s1646_s0 + $0x5c0] sm:$0xff]  ;;  %v199_v12 = vld [vmem:[%s1646_s0 + $0x5d0] sm:$0xff] }
  0x21   :  { %v673_v13 = vpack.c.bf16 %v200_v5, %v192_v4  ;;  %v206_v14 = vld [vmem:[%s1646_s0 + $0x608] sm:$0xff]  ;;  %v208_v17 = vld [vmem:[%s1646_s0 + $0x618] sm:$0xff]  ;;  %v611_v19 = vpack.c.bf16 %v197_v10, %v189_v7  ;;  %v675_v20 = vpack.c.bf16 %v199_v12, %v191_v11  ;;  %v205_v22 = vld [vmem:[%s1646_s0 + $0x600] sm:$0xff] }
  0x22   :  { %596 = vmatpush1.bf16.msra.mxu0 %v595_v34  ;;  %v214_v15 = vld [vmem:[%s1646_s0 + $0x648] sm:$0xff]  ;;  %v216_v18 = vld [vmem:[%s1646_s0 + $0x658] sm:$0xff]  ;;  %v213_v23 = vld [vmem:[%s1646_s0 + $0x640] sm:$0xff] }
  0x23   :  { %660 = vmatpush1.bf16.msra.mxu1 %v659_v35  ;;  %598 = vmatprep.subr.bf16.mxu0 %v597_v36  ;;  %v1133_v16 = vld [vmem:[%s1647_s1 + $0x8] sm:$0xff]  ;;  %v613_v21 = vpack.c.bf16 %v214_v15, %v206_v14  ;;  %v207_v24 = vld [vmem:[%s1646_s0 + $0x610] sm:$0xff]  ;;  %v677_v25 = vpack.c.bf16 %v216_v18, %v208_v17  ;;  %v224_v29 = vld [vmem:[%s1646_s0 + $0x698] sm:$0xff]  ;;  %v615_v31 = vpack.c.bf16 %v213_v23, %v205_v22 }
  0x24   :  { %662 = vmatprep.subr.bf16.mxu1 %v661_v40  ;;  %333 = vmatprep.mubr.f32.mxu0 %v1133_v16  ;;  %v215_v26 = vld [vmem:[%s1646_s0 + $0x650] sm:$0xff]  ;;  %v222_v27 = vld [vmem:[%s1646_s0 + $0x688] sm:$0xff]  ;;  %v232_v30 = vld [vmem:[%s1646_s0 + $0x6d8] sm:$0xff] }
  0x25   :  { %404 = vmatprep.mubr.f32.mxu1 %v1133_v16  ;;  %v230_v28 = vld [vmem:[%s1646_s0 + $0x6c8] sm:$0xff]  ;;  %v679_v32 = vpack.c.bf16 %v215_v26, %v207_v24  ;;  %v221_v34 = vld [vmem:[%s1646_s0 + $0x680] sm:$0xff]  ;;  %v223_v36 = vld [vmem:[%s1646_s0 + $0x690] sm:$0xff]  ;;  %v681_v37 = vpack.c.bf16 %v232_v30, %v224_v29 }
  0x26   :  { %600 = vmatpush1.bf16.msra.mxu0 %v599_v46  ;;  %v617_v33 = vpack.c.bf16 %v230_v28, %v222_v27  ;;  %v229_v35 = vld [vmem:[%s1646_s0 + $0x6c0] sm:$0xff]  ;;  %v231_v38 = vld [vmem:[%s1646_s0 + $0x6d0] sm:$0xff]  ;;  %v238_v39 = vld [vmem:[%s1646_s0 + $0x708] sm:$0xff] }
  0x27   :  { %664 = vmatpush1.bf16.msra.mxu1 %v663_v47  ;;  %602 = vmatprep.subr.bf16.mxu0 %v601_v48  ;;  %v246_v40 = vld [vmem:[%s1646_s0 + $0x748] sm:$0xff]  ;;  %v240_v41 = vld [vmem:[%s1646_s0 + $0x718] sm:$0xff]  ;;  %v619_v43 = vpack.c.bf16 %v229_v35, %v221_v34  ;;  %v683_v44 = vpack.c.bf16 %v231_v38, %v223_v36  ;;  %v237_v46 = vld [vmem:[%s1646_s0 + $0x700] sm:$0xff] }
  0x28   :  { %666 = vmatprep.subr.bf16.mxu1 %v665_v52  ;;  %v248_v42 = vld [vmem:[%s1646_s0 + $0x758] sm:$0xff]  ;;  %v621_v45 = vpack.c.bf16 %v246_v40, %v238_v39  ;;  %v245_v47 = vld [vmem:[%s1646_s0 + $0x740] sm:$0xff]  ;;  %v239_v48 = vld [vmem:[%s1646_s0 + $0x710] sm:$0xff] }
  0x29   :  { %v685_v49 = vpack.c.bf16 %v248_v42, %v240_v41  ;;  %v247_v50 = vld [vmem:[%s1646_s0 + $0x750] sm:$0xff]  ;;  %v254_v51 = vld [vmem:[%s1646_s0 + $0x788] sm:$0xff]  ;;  %v256_v53 = vld [vmem:[%s1646_s0 + $0x798] sm:$0xff]  ;;  %v623_v55 = vpack.c.bf16 %v245_v47, %v237_v46 }
  0x2a   :  { %604 = vmatpush1.bf16.msra.mxu0 %v603_v58  ;;  %v262_v52 = vld [vmem:[%s1646_s0 + $0x7c8] sm:$0xff]  ;;  %v264_v54 = vld [vmem:[%s1646_s0 + $0x7d8] sm:$0xff]  ;;  %v687_v56 = vpack.c.bf16 %v247_v50, %v239_v48  ;;  %v253_v58 = vld [vmem:[%s1646_s0 + $0x780] sm:$0xff] }
  0x2b   :  { %668 = vmatpush1.bf16.msra.mxu1 %v667_v59  ;;  %606 = vmatprep.subr.bf16.mxu0 %v605_v60  ;;  %v625_v57 = vpack.c.bf16 %v262_v52, %v254_v51  ;;  %v261_v59 = vld [vmem:[%s1646_s0 + $0x7c0] sm:$0xff]  ;;  %v255_v60 = vld [vmem:[%s1646_s0 + $0x790] sm:$0xff]  ;;  %v689_v61 = vpack.c.bf16 %v264_v54, %v256_v53  ;;  %v18_v63 = vld [vmem:[%s1646_s0 + $0x28] sm:$0xff] }
  0x2c   :  { %670 = vmatprep.subr.bf16.mxu1 %v669_v0  ;;  %v263_v62 = vld [vmem:[%s1646_s0 + $0x7d0] sm:$0xff]  ;;  %v26_v0 = vld [vmem:[%s1646_s0 + $0x68] sm:$0xff]  ;;  %v20_v1 = vld [vmem:[%s1646_s0 + $0x38] sm:$0xff]  ;;  %v627_v3 = vpack.c.bf16 %v261_v59, %v253_v58 }
  0x2d   :  { %v28_v2 = vld [vmem:[%s1646_s0 + $0x78] sm:$0xff]  ;;  %v691_v4 = vpack.c.bf16 %v263_v62, %v255_v60  ;;  %v693_v5 = vpack.c.bf16 %v26_v0, %v18_v63  ;;  %v25_v7 = vld [vmem:[%s1646_s0 + $0x60] sm:$0xff]  ;;  %v27_v10 = vld [vmem:[%s1646_s0 + $0x70] sm:$0xff] }
  0x2e   :  { %608 = vmatpush1.bf16.msra.mxu0 %v607_v6  ;;  %v17_v6 = vld [vmem:[%s1646_s0 + $0x20] sm:$0xff]  ;;  %v34_v11 = vld [vmem:[%s1646_s0 + $0xa8] sm:$0xff]  ;;  %v44_v14 = vld [vmem:[%s1646_s0 + $0xf8] sm:$0xff] }
  0x2f   :  { %672 = vmatpush1.bf16.msra.mxu1 %v671_v8  ;;  %610 = vmatprep.subr.bf16.mxu0 %v609_v9  ;;  %v19_v8 = vld [vmem:[%s1646_s0 + $0x30] sm:$0xff]  ;;  %v757_v9 = vpack.c.bf16 %v28_v2, %v20_v1  ;;  %v42_v12 = vld [vmem:[%s1646_s0 + $0xe8] sm:$0xff]  ;;  %v1266_v15 = vld [vmem:[%s1647_s1] sm:$0xff]  ;;  %v695_v17 = vpack.c.bf16 %v25_v7, %v17_v6 }
  0x30   :  { %674 = vmatprep.subr.bf16.mxu1 %v673_v13  ;;  %v36_v13 = vld [vmem:[%s1646_s0 + $0xb8] sm:$0xff]  ;;  %v759_v18 = vpack.c.bf16 %v27_v10, %v19_v8  ;;  %v35_v22 = vld [vmem:[%s1646_s0 + $0xb0] sm:$0xff]  ;;  %v58_v26 = vld [vmem:[%s1646_s0 + $0x168] sm:$0xff] }
  0x31   :  { %v761_v23 = vpack.c.bf16 %v44_v14, %v36_v13  ;;  %v43_v24 = vld [vmem:[%s1646_s0 + $0xf0] sm:$0xff]  ;;  %v52_v27 = vld [vmem:[%s1646_s0 + $0x138] sm:$0xff]  ;;  %v74_v38 = vld [vmem:[%s1646_s0 + $0x1e8] sm:$0xff] }
  0x32   :  { %612 = vmatpush1.bf16.msra.mxu0 %v611_v19  ;;  %v697_v19 = vpack.c.bf16 %v42_v12, %v34_v11  ;;  %v60_v28 = vld [vmem:[%s1646_s0 + $0x178] sm:$0xff]  ;;  %v763_v30 = vpack.c.bf16 %v43_v24, %v35_v22  ;;  %v51_v34 = vld [vmem:[%s1646_s0 + $0x130] sm:$0xff]  ;;  %v82_v48 = vld [vmem:[%s1646_s0 + $0x228] sm:$0xff] }
  0x33   :  { %676 = vmatpush1.bf16.msra.mxu1 %v675_v20  ;;  %614 = vmatprep.subr.bf16.mxu0 %v613_v21  ;;  %v33_v20 = vld [vmem:[%s1646_s0 + $0xa0] sm:$0xff]  ;;  %v765_v35 = vpack.c.bf16 %v60_v28, %v52_v27  ;;  %v59_v36 = vld [vmem:[%s1646_s0 + $0x170] sm:$0xff]  ;;  %v68_v39 = vld [vmem:[%s1646_s0 + $0x1b8] sm:$0xff] }
  0x34   :  { %678 = vmatprep.subr.bf16.mxu1 %v677_v25  ;;  %v41_v21 = vld [vmem:[%s1646_s0 + $0xe0] sm:$0xff]  ;;  %v50_v25 = vld [vmem:[%s1646_s0 + $0x128] sm:$0xff]  ;;  %v76_v40 = vld [vmem:[%s1646_s0 + $0x1f8] sm:$0xff]  ;;  %v767_v42 = vpack.c.bf16 %v59_v36, %v51_v34 }
  0x35   :  { %v699_v29 = vpack.c.bf16 %v41_v21, %v33_v20  ;;  %v67_v46 = vld [vmem:[%s1646_s0 + $0x1b0] sm:$0xff]  ;;  %v84_v50 = vld [vmem:[%s1646_s0 + $0x238] sm:$0xff]  ;;  %v98_v60 = vld [vmem:[%s1646_s0 + $0x2a8] sm:$0xff] }
  0x36   :  { %616 = vmatpush1.bf16.msra.mxu0 %v615_v31  ;;  %v701_v31 = vpack.c.bf16 %v58_v26, %v50_v25  ;;  %v75_v47 = vld [vmem:[%s1646_s0 + $0x1f0] sm:$0xff]  ;;  %v92_v51 = vld [vmem:[%s1646_s0 + $0x278] sm:$0xff]  ;;  %v114_v8 = vld [vmem:[%s1646_s0 + $0x328] sm:$0xff] }
  0x37   :  { %680 = vmatpush1.bf16.msra.mxu1 %v679_v32  ;;  %618 = vmatprep.subr.bf16.mxu0 %v617_v33  ;;  %v49_v32 = vld [vmem:[%s1646_s0 + $0x120] sm:$0xff]  ;;  %v771_v53 = vpack.c.bf16 %v75_v47, %v67_v46  ;;  %v773_v58 = vpack.c.bf16 %v92_v51, %v84_v50  ;;  %v91_v59 = vld [vmem:[%s1646_s0 + $0x270] sm:$0xff]  ;;  %v100_v62 = vld [vmem:[%s1646_s0 + $0x2b8] sm:$0xff] }
  0x38   :  { %682 = vmatprep.subr.bf16.mxu1 %v681_v37  ;;  %v57_v33 = vld [vmem:[%s1646_s0 + $0x160] sm:$0xff]  ;;  %v66_v37 = vld [vmem:[%s1646_s0 + $0x1a8] sm:$0xff]  ;;  %v108_v63 = vld [vmem:[%s1646_s0 + $0x2f8] sm:$0xff] }
  0x39   :  { %v703_v41 = vpack.c.bf16 %v57_v33, %v49_v32  ;;  %v777_v6 = vpack.c.bf16 %v108_v63, %v100_v62  ;;  %v107_v7 = vld [vmem:[%s1646_s0 + $0x2f0] sm:$0xff]  ;;  %v116_v10 = vld [vmem:[%s1646_s0 + $0x338] sm:$0xff]  ;;  %v130_v22 = vld [vmem:[%s1646_s0 + $0x3a8] sm:$0xff] }
  0x3a   :  { %620 = vmatpush1.bf16.msra.mxu0 %v619_v43  ;;  %v705_v43 = vpack.c.bf16 %v74_v38, %v66_v37  ;;  %v124_v11 = vld [vmem:[%s1646_s0 + $0x378] sm:$0xff]  ;;  %v123_v21 = vld [vmem:[%s1646_s0 + $0x370] sm:$0xff]  ;;  %v146_v34 = vld [vmem:[%s1646_s0 + $0x428] sm:$0xff] }
  0x3b   :  { %684 = vmatpush1.bf16.msra.mxu1 %v683_v44  ;;  %622 = vmatprep.subr.bf16.mxu0 %v621_v45  ;;  %v65_v44 = vld [vmem:[%s1646_s0 + $0x1a0] sm:$0xff]  ;;  %v781_v20 = vpack.c.bf16 %v124_v11, %v116_v10  ;;  %v132_v24 = vld [vmem:[%s1646_s0 + $0x3b8] sm:$0xff]  ;;  %v139_v33 = vld [vmem:[%s1646_s0 + $0x3f0] sm:$0xff] }
  0x3c   :  { %686 = vmatprep.subr.bf16.mxu1 %v685_v49  ;;  %v73_v45 = vld [vmem:[%s1646_s0 + $0x1e0] sm:$0xff]  ;;  %v90_v49 = vld [vmem:[%s1646_s0 + $0x268] sm:$0xff]  ;;  %v140_v25 = vld [vmem:[%s1646_s0 + $0x3f8] sm:$0xff] }
  0x3d   :  { %v707_v52 = vpack.c.bf16 %v73_v45, %v65_v44  ;;  %v709_v54 = vpack.c.bf16 %v90_v49, %v82_v48  ;;  %v785_v32 = vpack.c.bf16 %v140_v25, %v132_v24  ;;  %v148_v36 = vld [vmem:[%s1646_s0 + $0x438] sm:$0xff]  ;;  %v155_v45 = vld [vmem:[%s1646_s0 + $0x470] sm:$0xff]  ;;  %v162_v46 = vld [vmem:[%s1646_s0 + $0x4a8] sm:$0xff] }
  0x3e   :  { %624 = vmatpush1.bf16.msra.mxu0 %v623_v55  ;;  %v81_v55 = vld [vmem:[%s1646_s0 + $0x220] sm:$0xff]  ;;  %v156_v37 = vld [vmem:[%s1646_s0 + $0x478] sm:$0xff] }
  0x3f   :  { %688 = vmatpush1.bf16.msra.mxu1 %v687_v56  ;;  %626 = vmatprep.subr.bf16.mxu0 %v625_v57  ;;  %v89_v56 = vld [vmem:[%s1646_s0 + $0x260] sm:$0xff]  ;;  %v83_v57 = vld [vmem:[%s1646_s0 + $0x230] sm:$0xff]  ;;  %v789_v44 = vpack.c.bf16 %v156_v37, %v148_v36  ;;  %v164_v47 = vld [vmem:[%s1646_s0 + $0x4b8] sm:$0xff] }
  0x40   :  { %690 = vmatprep.subr.bf16.mxu1 %v689_v61  ;;  %v106_v61 = vld [vmem:[%s1646_s0 + $0x2e8] sm:$0xff]  ;;  %v711_v0 = vpack.c.bf16 %v89_v56, %v81_v55  ;;  %v775_v1 = vpack.c.bf16 %v91_v59, %v83_v57  ;;  %v172_v48 = vld [vmem:[%s1646_s0 + $0x4f8] sm:$0xff]  ;;  %v171_v56 = vld [vmem:[%s1646_s0 + $0x4f0] sm:$0xff] }
  0x41   :  { %v713_v2 = vpack.c.bf16 %v106_v61, %v98_v60  ;;  %v793_v55 = vpack.c.bf16 %v172_v48, %v164_v47  ;;  %v178_v57 = vld [vmem:[%s1646_s0 + $0x528] sm:$0xff]  ;;  %v180_v59 = vld [vmem:[%s1646_s0 + $0x538] sm:$0xff] }
  0x42   :  { %628 = vmatpush1.bf16.msra.mxu0 %v627_v3  ;;  %v97_v3 = vld [vmem:[%s1646_s0 + $0x2a0] sm:$0xff]  ;;  %v188_v60 = vld [vmem:[%s1646_s0 + $0x578] sm:$0xff] }
  0x43   :  { %692 = vmatpush1.bf16.msra.mxu1 %v691_v4  ;;  %694 = vmatprep.subr.bf16.mxu0 %v693_v5  ;;  %v105_v4 = vld [vmem:[%s1646_s0 + $0x2e0] sm:$0xff]  ;;  %v99_v5 = vld [vmem:[%s1646_s0 + $0x2b0] sm:$0xff] }
  0x44   :  { %758 = vmatprep.subr.bf16.mxu1 %v757_v9  ;;  %v122_v9 = vld [vmem:[%s1646_s0 + $0x368] sm:$0xff]  ;;  %v715_v12 = vpack.c.bf16 %v105_v4, %v97_v3  ;;  %v779_v13 = vpack.c.bf16 %v107_v7, %v99_v5  ;;  %v797_v3 = vpack.c.bf16 %v188_v60, %v180_v59  ;;  %v187_v4 = vld [vmem:[%s1646_s0 + $0x570] sm:$0xff]  ;;  %v196_v7 = vld [vmem:[%s1646_s0 + $0x5b8] sm:$0xff] }
  0x45   :  { %334 = vmatmul.mubr.f32.vlgmr.msra.gmra.mrb[0].mxu0 %v1266_v15  ;;  %v717_v14 = vpack.c.bf16 %v122_v9, %v114_v8  ;;  %v194_v5 = vld [vmem:[%s1646_s0 + $0x5a8] sm:$0xff]  ;;  %v204_v8 = vld [vmem:[%s1646_s0 + $0x5f8] sm:$0xff] }
  0x46   :  { %405 = vmatmul.mubr.f32.vlgmr.msra.gmra.mrb[0].mxu1 %v1266_v15  ;;  %696 = vmatpush1.bf16.msra.mxu0 %v695_v17  ;;  %v113_v17 = vld [vmem:[%s1646_s0 + $0x320] sm:$0xff] }
  0x47   :  { %760 = vmatpush1.bf16.msra.mxu1 %v759_v18  ;;  %698 = vmatprep.subr.bf16.mxu0 %v697_v19  ;;  %v121_v18 = vld [vmem:[%s1646_s0 + $0x360] sm:$0xff]  ;;  %v115_v19 = vld [vmem:[%s1646_s0 + $0x330] sm:$0xff] }
  0x48   :  { %762 = vmatprep.subr.bf16.mxu1 %v761_v23  ;;  %475 = vmatprep.mubr.f32.mxu0 %v1133_v16  ;;  %v138_v23 = vld [vmem:[%s1646_s0 + $0x3e8] sm:$0xff]  ;;  %v719_v26 = vpack.c.bf16 %v121_v18, %v113_v17  ;;  %v783_v27 = vpack.c.bf16 %v123_v21, %v115_v19  ;;  %v801_v17 = vpack.c.bf16 %v204_v8, %v196_v7  ;;  %v203_v18 = vld [vmem:[%s1646_s0 + $0x5f0] sm:$0xff]  ;;  %v212_v21 = vld [vmem:[%s1646_s0 + $0x638] sm:$0xff] }
  0x49   :  { %546 = vmatprep.mubr.f32.mxu1 %v1133_v16  ;;  %v769_v16 = vpack.c.bf16 %v76_v40, %v68_v39  ;;  %v721_v28 = vpack.c.bf16 %v138_v23, %v130_v22  ;;  %v210_v19 = vld [vmem:[%s1646_s0 + $0x628] sm:$0xff]  ;;  %v220_v22 = vld [vmem:[%s1646_s0 + $0x678] sm:$0xff] }
  0x4a   :  { %700 = vmatpush1.bf16.msra.mxu0 %v699_v29  ;;  %v129_v29 = vld [vmem:[%s1646_s0 + $0x3a0] sm:$0xff] }
  0x4b   :  { %764 = vmatpush1.bf16.msra.mxu1 %v763_v30  ;;  %702 = vmatprep.subr.bf16.mxu0 %v701_v31  ;;  %v137_v30 = vld [vmem:[%s1646_s0 + $0x3e0] sm:$0xff]  ;;  %v131_v31 = vld [vmem:[%s1646_s0 + $0x3b0] sm:$0xff] }
  0x4c   :  { %766 = vmatprep.subr.bf16.mxu1 %v765_v35  ;;  %v154_v35 = vld [vmem:[%s1646_s0 + $0x468] sm:$0xff]  ;;  %v723_v38 = vpack.c.bf16 %v137_v30, %v129_v29  ;;  %v787_v39 = vpack.c.bf16 %v139_v33, %v131_v31  ;;  %v805_v29 = vpack.c.bf16 %v220_v22, %v212_v21  ;;  %v219_v30 = vld [vmem:[%s1646_s0 + $0x670] sm:$0xff]  ;;  %v228_v33 = vld [vmem:[%s1646_s0 + $0x6b8] sm:$0xff] }
  0x4d   :  { %v725_v40 = vpack.c.bf16 %v154_v35, %v146_v34  ;;  %v226_v31 = vld [vmem:[%s1646_s0 + $0x6a8] sm:$0xff]  ;;  %v236_v34 = vld [vmem:[%s1646_s0 + $0x6f8] sm:$0xff] }
  0x4e   :  { %704 = vmatpush1.bf16.msra.mxu0 %v703_v41  ;;  %v145_v41 = vld [vmem:[%s1646_s0 + $0x420] sm:$0xff] }
  0x4f   :  { %768 = vmatpush1.bf16.msra.mxu1 %v767_v42  ;;  %706 = vmatprep.subr.bf16.mxu0 %v705_v43  ;;  %v153_v42 = vld [vmem:[%s1646_s0 + $0x460] sm:$0xff]  ;;  %v147_v43 = vld [vmem:[%s1646_s0 + $0x430] sm:$0xff] }
  0x50   :  { %770 = vmatprep.subr.bf16.mxu1 %v769_v16  ;;  %v170_v16 = vld [vmem:[%s1646_s0 + $0x4e8] sm:$0xff]  ;;  %v727_v49 = vpack.c.bf16 %v153_v42, %v145_v41  ;;  %v791_v50 = vpack.c.bf16 %v155_v45, %v147_v43  ;;  %v809_v41 = vpack.c.bf16 %v236_v34, %v228_v33  ;;  %v235_v42 = vld [vmem:[%s1646_s0 + $0x6f0] sm:$0xff]  ;;  %v244_v45 = vld [vmem:[%s1646_s0 + $0x738] sm:$0xff] }
  0x51   :  { %v729_v51 = vpack.c.bf16 %v170_v16, %v162_v46  ;;  %v242_v43 = vld [vmem:[%s1646_s0 + $0x728] sm:$0xff]  ;;  %v252_v46 = vld [vmem:[%s1646_s0 + $0x778] sm:$0xff] }
  0x52   :  { %708 = vmatpush1.bf16.msra.mxu0 %v707_v52  ;;  %v161_v52 = vld [vmem:[%s1646_s0 + $0x4a0] sm:$0xff] }
  0x53   :  { %772 = vmatpush1.bf16.msra.mxu1 %v771_v53  ;;  %710 = vmatprep.subr.bf16.mxu0 %v709_v54  ;;  %v169_v53 = vld [vmem:[%s1646_s0 + $0x4e0] sm:$0xff]  ;;  %v163_v54 = vld [vmem:[%s1646_s0 + $0x4b0] sm:$0xff] }
  0x54   :  { %774 = vmatprep.subr.bf16.mxu1 %v773_v58  ;;  %v186_v58 = vld [vmem:[%s1646_s0 + $0x568] sm:$0xff]  ;;  %v731_v61 = vpack.c.bf16 %v169_v53, %v161_v52  ;;  %v795_v62 = vpack.c.bf16 %v171_v56, %v163_v54  ;;  %v813_v52 = vpack.c.bf16 %v252_v46, %v244_v45  ;;  %v251_v53 = vld [vmem:[%s1646_s0 + $0x770] sm:$0xff]  ;;  %v260_v56 = vld [vmem:[%s1646_s0 + $0x7b8] sm:$0xff] }
  0x55   :  { %v733_v63 = vpack.c.bf16 %v186_v58, %v178_v57  ;;  %v258_v54 = vld [vmem:[%s1646_s0 + $0x7a8] sm:$0xff]  ;;  %v268_v57 = vld [vmem:[%s1646_s0 + $0x7f8] sm:$0xff] }
  0x56   :  { %712 = vmatpush1.bf16.msra.mxu0 %v711_v0  ;;  %v177_v0 = vld [vmem:[%s1646_s0 + $0x520] sm:$0xff] }
  0x57   :  { %776 = vmatpush1.bf16.msra.mxu1 %v775_v1  ;;  %714 = vmatprep.subr.bf16.mxu0 %v713_v2  ;;  %v185_v1 = vld [vmem:[%s1646_s0 + $0x560] sm:$0xff]  ;;  %v179_v2 = vld [vmem:[%s1646_s0 + $0x530] sm:$0xff] }
  0x58   :  { %778 = vmatprep.subr.bf16.mxu1 %v777_v6  ;;  %v202_v6 = vld [vmem:[%s1646_s0 + $0x5e8] sm:$0xff]  ;;  %v735_v9 = vpack.c.bf16 %v185_v1, %v177_v0  ;;  %v799_v10 = vpack.c.bf16 %v187_v4, %v179_v2  ;;  %v259_v0 = vld [vmem:[%s1646_s0 + $0x7b0] sm:$0xff] }
  0x59   :  { %v737_v11 = vpack.c.bf16 %v202_v6, %v194_v5  ;;  %v267_v1 = vld [vmem:[%s1646_s0 + $0x7f0] sm:$0xff] }
  0x5a   :  { %716 = vmatpush1.bf16.msra.mxu0 %v715_v12  ;;  %v193_v12 = vld [vmem:[%s1646_s0 + $0x5a0] sm:$0xff] }
  0x5b   :  { %780 = vmatpush1.bf16.msra.mxu1 %v779_v13  ;;  %718 = vmatprep.subr.bf16.mxu0 %v717_v14  ;;  %v201_v13 = vld [vmem:[%s1646_s0 + $0x5e0] sm:$0xff]  ;;  %v195_v14 = vld [vmem:[%s1646_s0 + $0x5b0] sm:$0xff] }
  0x5c   :  { %782 = vmatprep.subr.bf16.mxu1 %v781_v20  ;;  %v218_v20 = vld [vmem:[%s1646_s0 + $0x668] sm:$0xff]  ;;  %v739_v23 = vpack.c.bf16 %v201_v13, %v193_v12  ;;  %v803_v24 = vpack.c.bf16 %v203_v18, %v195_v14 }
  0x5d   :  { %v741_v25 = vpack.c.bf16 %v218_v20, %v210_v19 }
  0x5e   :  { %720 = vmatpush1.bf16.msra.mxu0 %v719_v26  ;;  %v209_v26 = vld [vmem:[%s1646_s0 + $0x620] sm:$0xff] }
  0x5f   :  { %784 = vmatpush1.bf16.msra.mxu1 %v783_v27  ;;  %722 = vmatprep.subr.bf16.mxu0 %v721_v28  ;;  %v217_v27 = vld [vmem:[%s1646_s0 + $0x660] sm:$0xff]  ;;  %v211_v28 = vld [vmem:[%s1646_s0 + $0x630] sm:$0xff] }
  0x60   :  { %786 = vmatprep.subr.bf16.mxu1 %v785_v32  ;;  %v234_v32 = vld [vmem:[%s1646_s0 + $0x6e8] sm:$0xff]  ;;  %v743_v35 = vpack.c.bf16 %v217_v27, %v209_v26  ;;  %v807_v36 = vpack.c.bf16 %v219_v30, %v211_v28 }
  0x61   :  { %v745_v37 = vpack.c.bf16 %v234_v32, %v226_v31 }
  0x62   :  { %724 = vmatpush1.bf16.msra.mxu0 %v723_v38  ;;  %v225_v38 = vld [vmem:[%s1646_s0 + $0x6a0] sm:$0xff] }
  0x63   :  { %788 = vmatpush1.bf16.msra.mxu1 %v787_v39  ;;  %726 = vmatprep.subr.bf16.mxu0 %v725_v40  ;;  %v233_v39 = vld [vmem:[%s1646_s0 + $0x6e0] sm:$0xff]  ;;  %v227_v40 = vld [vmem:[%s1646_s0 + $0x6b0] sm:$0xff] }
  0x64   :  { %790 = vmatprep.subr.bf16.mxu1 %v789_v44  ;;  %v250_v44 = vld [vmem:[%s1646_s0 + $0x768] sm:$0xff]  ;;  %v747_v16 = vpack.c.bf16 %v233_v39, %v225_v38  ;;  %v811_v47 = vpack.c.bf16 %v235_v42, %v227_v40 }
  0x65   :  { %v749_v48 = vpack.c.bf16 %v250_v44, %v242_v43 }
  0x66   :  { %728 = vmatpush1.bf16.msra.mxu0 %v727_v49  ;;  %v241_v49 = vld [vmem:[%s1646_s0 + $0x720] sm:$0xff] }
  0x67   :  { %792 = vmatpush1.bf16.msra.mxu1 %v791_v50  ;;  %730 = vmatprep.subr.bf16.mxu0 %v729_v51  ;;  %v249_v50 = vld [vmem:[%s1646_s0 + $0x760] sm:$0xff]  ;;  %v243_v51 = vld [vmem:[%s1646_s0 + $0x730] sm:$0xff] }
  0x68   :  { %794 = vmatprep.subr.bf16.mxu1 %v793_v55  ;;  %v266_v55 = vld [vmem:[%s1646_s0 + $0x7e8] sm:$0xff]  ;;  %v751_v58 = vpack.c.bf16 %v249_v50, %v241_v49  ;;  %v815_v59 = vpack.c.bf16 %v251_v53, %v243_v51 }
  0x69   :  { %v753_v60 = vpack.c.bf16 %v266_v55, %v258_v54 }
  0x6a   :  { %732 = vmatpush1.bf16.msra.mxu0 %v731_v61  ;;  %v257_v61 = vld [vmem:[%s1646_s0 + $0x7a0] sm:$0xff] }
  0x6b   :  { %796 = vmatpush1.bf16.msra.mxu1 %v795_v62  ;;  %734 = vmatprep.subr.bf16.mxu0 %v733_v63  ;;  %v265_v62 = vld [vmem:[%s1646_s0 + $0x7e0] sm:$0xff]  ;;  %v817_v63 = vpack.c.bf16 %v268_v57, %v260_v56 }
  0x6c   :  { %798 = vmatprep.subr.bf16.mxu1 %v797_v3  ;;  %v755_v2 = vpack.c.bf16 %v265_v62, %v257_v61  ;;  %v819_v3 = vpack.c.bf16 %v267_v1, %v259_v0 }
  0x6e   :  { %736 = vmatpush1.bf16.msra.mxu0 %v735_v9 }
  0x6f   :  { %800 = vmatpush1.bf16.msra.mxu1 %v799_v10  ;;  %738 = vmatprep.subr.bf16.mxu0 %v737_v11 }
  0x70   :  { %802 = vmatprep.subr.bf16.mxu1 %v801_v17 }
  0x72   :  { %740 = vmatpush1.bf16.msra.mxu0 %v739_v23 }
  0x73   :  { %804 = vmatpush1.bf16.msra.mxu1 %v803_v24  ;;  %742 = vmatprep.subr.bf16.mxu0 %v741_v25 }
  0x74   :  { %806 = vmatprep.subr.bf16.mxu1 %v805_v29 }
  0x76   :  { %744 = vmatpush1.bf16.msra.mxu0 %v743_v35 }
  0x77   :  { %808 = vmatpush1.bf16.msra.mxu1 %v807_v36  ;;  %746 = vmatprep.subr.bf16.mxu0 %v745_v37 }
  0x78   :  { %810 = vmatprep.subr.bf16.mxu1 %v809_v41 }
  0x7a   :  { %748 = vmatpush1.bf16.msra.mxu0 %v747_v16 }
  0x7b   :  { %812 = vmatpush1.bf16.msra.mxu1 %v811_v47  ;;  %750 = vmatprep.subr.bf16.mxu0 %v749_v48 }
  0x7c   :  { %814 = vmatprep.subr.bf16.mxu1 %v813_v52 }
  0x7e   :  { %752 = vmatpush1.bf16.msra.mxu0 %v751_v58 }
  0x7f   :  { %816 = vmatpush1.bf16.msra.mxu1 %v815_v59  ;;  %754 = vmatprep.subr.bf16.mxu0 %v753_v60 }
  0x80   :  { %818 = vmatprep.subr.bf16.mxu1 %v817_v63 }
  0x82   :  { %756 = vmatpush1.bf16.msra.mxu0 %v755_v2 }
  0x83   :  { %820 = vmatpush1.bf16.msra.mxu1 %v819_v3 }
  0x85   :  { %476 = vmatmul.mubr.f32.vlgmr.msra.gmra.mrb[2].mxu0 %v1266_v15 }
  0x86   :  { %547 = vmatmul.mubr.f32.vlgmr.msra.gmra.mrb[2].mxu1 %v1266_v15 }
 0x118   :  { %v335_v4 = vpop.f32.mrb[0].mxu0 }
 0x119   :  { %553 = vst [vmem:[%s1648_s2] sm:$0xff] %v335_v4  ;;  %v406_v5 = vpop.f32.mrb[0].mxu1  ;;  %v337_v6 = vpop.f32.mrb[1].mxu0 }
 0x11a   :  { %555 = vst [vmem:[%s1648_s2 + $0x10] sm:$0xff] %v406_v5  ;;  %554 = vst [vmem:[%s1648_s2 + $0x8] sm:$0xff] %v337_v6  ;;  %v408_v7 = vpop.f32.mrb[1].mxu1 }
 0x11b   :  { %556 = vst [vmem:[%s1648_s2 + $0x18] sm:$0xff] %v408_v7 }
 0x158   :  { %v477_v15 = vpop.f32.mrb[2].mxu0 }
 0x159   :  { %557 = vst [vmem:[%s1648_s2 + $0x20] sm:$0xff] %v477_v15  ;;  %v548_v8 = vpop.f32.mrb[2].mxu1  ;;  %v479_v9 = vpop.f32.mrb[3].mxu0 }
 0x15a   :  { %559 = vst [vmem:[%s1648_s2 + $0x30] sm:$0xff] %v548_v8  ;;  %558 = vst [vmem:[%s1648_s2 + $0x28] sm:$0xff] %v479_v9  ;;  %v550_v10 = vpop.f32.mrb[3].mxu1 }
 0x15b   :  { %560 = vst [vmem:[%s1648_s2 + $0x38] sm:$0xff] %v550_v10 }

</bundles_post_ra>
